<compile_context>
chip_gen: v7x
topology: tpu7x:2x2x1
jax: 0.10.0
libtpu: 0.0.40
codegen_flags: <defaults>
</compile_context>

<pallas_src>
import functools

import jax
import jax.numpy as jnp
from jax.experimental import pallas as pl
from jax.experimental.pallas import tpu as pltpu

LANE = 128


def _round_up(x, m):
    return (x + m - 1) // m * m


@functools.lru_cache(maxsize=None)
def _vmem_limit_bytes():
    """Generation-aware VMEM budget (v5e/v6e: 128 MiB physical, v7x: 64 MiB)."""
    cap = 64 * 1024 * 1024
    try:
        cap = int(pltpu.get_tpu_info().vmem_capacity_bytes)
    except Exception:
        pass
    if cap >= 100 * 1024 * 1024:                        # v5e / v6e
        return int(0.80 * cap)
    return min(56 * 1024 * 1024, int(0.85 * cap))       # v7x


def _masked_log_softmax(z, dim_out):
    """log_softmax over axis=1, ignoring zero-padded lanes >= dim_out."""
    col = jax.lax.broadcasted_iota(jnp.int32, z.shape, 1)
    valid = col < dim_out
    zm = jnp.where(valid, z, -jnp.inf)
    m = jnp.max(zm, axis=1, keepdims=True)
    e = jnp.where(valid, jnp.exp(z - m), 0.0)
    lse = jnp.log(jnp.sum(e, axis=1, keepdims=True)) + m
    return z - lse


# ---------------------------------------------------------------------------
# Kernels
# ---------------------------------------------------------------------------
def project_kernel(x_ref, w_ref, p_ref):
    """P_tile = X_tile @ W (bf16 out, f32 accumulate)."""
    p_ref[...] = jnp.dot(x_ref[...], w_ref[...],
                         preferred_element_type=jnp.float32).astype(p_ref.dtype)


def gcn_layer1_kernel(a_ref, p_ref, b1_ref, mask_ref, h_ref, acc_ref):
    """acc += A(tm,tk) @ P1(tk,f_h); epilogue: H = dropout(relu(acc + b1))."""
    k = pl.program_id(1)

    @pl.when(k == 0)
    def _():
        acc_ref[...] = jnp.zeros_like(acc_ref)

    acc_ref[...] += jnp.dot(a_ref[...], p_ref[...],
                            preferred_element_type=jnp.float32)

    @pl.when(k == pl.num_programs(1) - 1)
    def _():
        z = acc_ref[...] + b1_ref[...]
        h = jnp.maximum(z, 0.0) * mask_ref[...].astype(jnp.float32)
        h_ref[...] = h.astype(h_ref.dtype)


def gcn_layer2_kernel(a_ref, p_ref, b2_ref, z_ref, logp_ref, acc_ref, *, dim_out):
    """acc += A(tm,tk) @ P2(tk,f_out); epilogue: z = acc + b2, logp = log_softmax(z)."""
    k = pl.program_id(1)

    @pl.when(k == 0)
    def _():
        acc_ref[...] = jnp.zeros_like(acc_ref)

    acc_ref[...] += jnp.dot(a_ref[...], p_ref[...],
                            preferred_element_type=jnp.float32)

    @pl.when(k == pl.num_programs(1) - 1)
    def _():
        z = acc_ref[...] + b2_ref[...]
        z_ref[...] = z
        logp_ref[...] = _masked_log_softmax(z, dim_out)


def gcn_fused_kernel(a_ref, x_ref, w1_ref, b1_ref, mask_ref, w2_ref, b2_ref,
                     z_ref, logp_ref, *, dim_out):
    """Whole forward for small graphs: A, X, weights all VMEM-resident, one call."""
    p1 = jnp.dot(x_ref[...], w1_ref[...], preferred_element_type=jnp.float32)
    h = jnp.dot(a_ref[...], p1.astype(jnp.bfloat16),
                preferred_element_type=jnp.float32) + b1_ref[...]
    h = jnp.maximum(h, 0.0) * mask_ref[...].astype(jnp.float32)
    p2 = jnp.dot(h.astype(jnp.bfloat16), w2_ref[...],
                 preferred_element_type=jnp.float32)
    z = jnp.dot(a_ref[...], p2.astype(jnp.bfloat16),
                preferred_element_type=jnp.float32) + b2_ref[...]
    z_ref[...] = z
    logp_ref[...] = _masked_log_softmax(z, dim_out)


# ---------------------------------------------------------------------------
# Plain-JAX glue
# ---------------------------------------------------------------------------
def normalized_adjacency(edge_index, num_nodes):
    """Dense D^-1/2 (A + I) D^-1/2 following PyG GCNConv's gcn_norm."""
    row, col = edge_index[0], edge_index[1]
    self_loops = jnp.arange(num_nodes, dtype=edge_index.dtype)
    row = jnp.concatenate([row, self_loops])
    col = jnp.concatenate([col, self_loops])
    ones = jnp.ones(row.shape, jnp.float32)
    deg = jnp.zeros((num_nodes,), jnp.float32).at[col].add(ones)
    dinv = jnp.where(deg > 0, 1.0 / jnp.sqrt(deg), 0.0)
    norm = dinv[row] * dinv[col]
    # out[i] = sum over edges (j -> i) norm * x[j]  =>  A_hat[target, source]
    return jnp.zeros((num_nodes, num_nodes), jnp.float32).at[col, row].add(norm)


@functools.partial(jax.jit,
                   static_argnames=("num_nodes", "force_tiled", "tk_target"))
def gcn_forward(x, edge_index, params, dropout_key, *, num_nodes,
                force_tiled=False, tk_target=None):
    w1, b1, w2, b2 = params
    dim_in, dim_h = w1.shape
    dim_out = w2.shape[1]
    n = x.shape[0]

    f_in = _round_up(dim_in, LANE)
    f_h = _round_up(dim_h, LANE)
    f_out = _round_up(dim_out, LANE)

    vmem_limit = _vmem_limit_bytes()
    if tk_target is None:
        tk_target = 2048 if vmem_limit >= 80 * 1024 * 1024 else 1024

    a_hat = normalized_adjacency(edge_index, num_nodes).astype(jnp.bfloat16)

    def pad2(arr, shape, dtype):
        out = jnp.zeros(shape, dtype)
        return out.at[:arr.shape[0], :arr.shape[1]].set(arr.astype(dtype))

    w1_p = pad2(w1, (f_in, f_h), jnp.bfloat16)
    b1_p = pad2(jnp.reshape(b1, (1, -1)), (1, f_h), jnp.float32)
    w2_p = pad2(w2, (f_h, f_out), jnp.bfloat16)
    b2_p = pad2(jnp.reshape(b2, (1, -1)), (1, f_out), jnp.float32)

    # ---------------- fused small-graph path ----------------
    n128 = _round_up(n, LANE)
    fused_bytes = (n128 * n128 * 2 + n128 * (f_in + f_h) * 2
                   + (f_in * f_h + f_h * f_out) * 2
                   + 2 * n128 * f_out * 4
                   + 3 * n128 * max(f_h, f_out) * 4)          # intermediates slack
    use_fused = (not force_tiled) and fused_bytes <= 20 * 1024 * 1024

    if use_fused:
        a_p = pad2(a_hat, (n128, n128), jnp.bfloat16)
        x_p = pad2(x, (n128, f_in), jnp.bfloat16)
        # dropout p=0.5, training=True (F.dropout default): keep w.p. 0.5, scale x2
        keep = jax.random.bernoulli(dropout_key, 0.5, (n128, f_h))
        mask = jnp.where(keep, 2.0, 0.0).astype(jnp.bfloat16)
        z_p, logp_p = pl.pallas_call(
            functools.partial(gcn_fused_kernel, dim_out=dim_out),
            out_shape=(jax.ShapeDtypeStruct((n128, f_out), jnp.float32),
                       jax.ShapeDtypeStruct((n128, f_out), jnp.float32)),
            compiler_params=pltpu.CompilerParams(vmem_limit_bytes=vmem_limit),
        )(a_p, x_p, w1_p, b1_p, mask, w2_p, b2_p)
        return z_p[:n, :dim_out], logp_p[:n, :dim_out]

    # ---------------- row x contraction tiled path ----------------
    tm = min(512, n128)
    # guarantee >= 2 row blocks where possible so both v7x TensorCores get work
    while tm > LANE and _round_up(n, tm) // tm < 2:
        tm //= 2
    n_pad = _round_up(n, tm)
    # largest multiple of tm that divides n_pad and is <= tk_target
    tk, c = tm, tm
    while c <= min(tk_target, n_pad):
        if n_pad % c == 0:
            tk = c
        c += tm
    grid_m, grid_k = n_pad // tm, n_pad // tk

    a_p = pad2(a_hat, (n_pad, n_pad), jnp.bfloat16)
    x_p = pad2(x, (n_pad, f_in), jnp.bfloat16)
    keep = jax.random.bernoulli(dropout_key, 0.5, (n_pad, f_h))
    mask = jnp.where(keep, 2.0, 0.0).astype(jnp.bfloat16)

    cp_proj = pltpu.CompilerParams(dimension_semantics=("parallel",),
                                   vmem_limit_bytes=vmem_limit)
    cp_mm = pltpu.CompilerParams(dimension_semantics=("parallel", "arbitrary"),
                                 vmem_limit_bytes=vmem_limit)

    # P1 = X @ W1 : narrow projection done before the N^2 matmul.
    # TODO(synk): also tile f_in here for extremely wide raw feature matrices.
    p1 = pl.pallas_call(
        project_kernel,
        out_shape=jax.ShapeDtypeStruct((n_pad, f_h), jnp.bfloat16),
        grid=(grid_m,),
        in_specs=[pl.BlockSpec((tm, f_in), lambda i: (i, 0)),
                  pl.BlockSpec((f_in, f_h), lambda i: (0, 0))],
        out_specs=pl.BlockSpec((tm, f_h), lambda i: (i, 0)),
        compiler_params=cp_proj,
    )(x_p, w1_p)

    # H = dropout(relu(A @ P1 + b1))
    cost1 = pl.CostEstimate(
        flops=2 * n_pad * n_pad * f_h,
        transcendentals=0,
        bytes_accessed=(n_pad * n_pad * 2 + grid_m * n_pad * f_h * 2
                        + 2 * n_pad * f_h * 2))
    h = pl.pallas_call(
        gcn_layer1_kernel,
        out_shape=jax.ShapeDtypeStruct((n_pad, f_h), jnp.bfloat16),
        grid=(grid_m, grid_k),
        in_specs=[pl.BlockSpec((tm, tk), lambda i, k: (i, k)),     # A tile
                  pl.BlockSpec((tk, f_h), lambda i, k: (k, 0)),    # P1 k-slab
                  pl.BlockSpec((1, f_h), lambda i, k: (0, 0)),     # b1
                  pl.BlockSpec((tm, f_h), lambda i, k: (i, 0))],   # dropout mask
        out_specs=pl.BlockSpec((tm, f_h), lambda i, k: (i, 0)),
        scratch_shapes=[pltpu.VMEM((tm, f_h), jnp.float32)],
        compiler_params=cp_mm,
        cost_estimate=cost1,
    )(a_p, p1, b1_p, mask)

    # P2 = H @ W2
    p2 = pl.pallas_call(
        project_kernel,
        out_shape=jax.ShapeDtypeStruct((n_pad, f_out), jnp.bfloat16),
        grid=(grid_m,),
        in_specs=[pl.BlockSpec((tm, f_h), lambda i: (i, 0)),
                  pl.BlockSpec((f_h, f_out), lambda i: (0, 0))],
        out_specs=pl.BlockSpec((tm, f_out), lambda i: (i, 0)),
        compiler_params=cp_proj,
    )(h, w2_p)

    # Z = A @ P2 + b2 ; logp = log_softmax(Z, axis=1)
    cost2 = pl.CostEstimate(
        flops=2 * n_pad * n_pad * f_out,
        transcendentals=n_pad * f_out,
        bytes_accessed=(n_pad * n_pad * 2 + grid_m * n_pad * f_out * 2
                        + 2 * n_pad * f_out * 4))
    z_p, logp_p = pl.pallas_call(
        functools.partial(gcn_layer2_kernel, dim_out=dim_out),
        out_shape=(jax.ShapeDtypeStruct((n_pad, f_out), jnp.float32),
                   jax.ShapeDtypeStruct((n_pad, f_out), jnp.float32)),
        grid=(grid_m, grid_k),
        in_specs=[pl.BlockSpec((tm, tk), lambda i, k: (i, k)),
                  pl.BlockSpec((tk, f_out), lambda i, k: (k, 0)),
                  pl.BlockSpec((1, f_out), lambda i, k: (0, 0))],
        out_specs=(pl.BlockSpec((tm, f_out), lambda i, k: (i, 0)),
                   pl.BlockSpec((tm, f_out), lambda i, k: (i, 0))),
        scratch_shapes=[pltpu.VMEM((tm, f_out), jnp.float32)],
        compiler_params=cp_mm,
        cost_estimate=cost2,
    )(a_p, p2, b2_p)

    return z_p[:n, :dim_out], logp_p[:n, :dim_out]


def init_params(key, dim_in, dim_h, dim_out):
    k1, k2 = jax.random.split(key)
    w1 = jax.random.normal(k1, (dim_in, dim_h), jnp.float32) * (1.0 / jnp.sqrt(dim_in))
    b1 = jnp.zeros((1, dim_h), jnp.float32)
    w2 = jax.random.normal(k2, (dim_h, dim_out), jnp.float32) * (1.0 / jnp.sqrt(dim_h))
    b2 = jnp.zeros((1, dim_out), jnp.float32)
    return (w1, b1, w2, b2)


if __name__ == "__main__":
    key = jax.random.PRNGKey(0)
    kx, ke, kp, kd, kx2, ke2, kp2, kd2 = jax.random.split(key, 8)

    # --- small graph: hits the fused single-kernel path ---
    N, E = 16, 40
    DIM_IN, DIM_H, DIM_OUT = 8, 32, 8
    x = jax.random.normal(kx, (N, DIM_IN), jnp.float32)
    edge_index = jax.random.randint(ke, (2, E), 0, N, dtype=jnp.int32)
    params = init_params(kp, DIM_IN, DIM_H, DIM_OUT)
    out, logp = gcn_forward(x, edge_index, params, kd, num_nodes=N)
    jax.block_until_ready((out, logp))
    assert out.shape == (N, DIM_OUT) and logp.shape == (N, DIM_OUT)
    assert bool(jnp.all(jnp.isfinite(out))) and bool(jnp.all(jnp.isfinite(logp)))

    # --- larger graph: exercise the row x contraction tiled path (accumulator) ---
    N2, E2 = 700, 3000
    DIN2, DH2, DOUT2 = 48, 32, 10
    x2 = jax.random.normal(kx2, (N2, DIN2), jnp.float32)
    edge_index2 = jax.random.randint(ke2, (2, E2), 0, N2, dtype=jnp.int32)
    params2 = init_params(kp2, DIN2, DH2, DOUT2)
    out2, logp2 = gcn_forward(x2, edge_index2, params2, kd2, num_nodes=N2,
                              force_tiled=True, tk_target=512)
    jax.block_until_ready((out2, logp2))
    assert out2.shape == (N2, DOUT2) and logp2.shape == (N2, DOUT2)
    assert bool(jnp.all(jnp.isfinite(out2))) and bool(jnp.all(jnp.isfinite(logp2)))

    print("KERNEL_OK")
</pallas_src>

<mosaic_0001>
module attributes {stable_mosaic.version = 11 : i64} {
  func.func @gcn_fused_kernel(%arg0: memref<128x128xbf16, #tpu.memory_space<vmem>>, %arg1: memref<128x128xbf16, #tpu.memory_space<vmem>>, %arg2: memref<128x128xbf16, #tpu.memory_space<vmem>>, %arg3: memref<1x128xf32, #tpu.memory_space<vmem>>, %arg4: memref<128x128xbf16, #tpu.memory_space<vmem>>, %arg5: memref<128x128xbf16, #tpu.memory_space<vmem>>, %arg6: memref<1x128xf32, #tpu.memory_space<vmem>>, %arg7: memref<128x128xf32, #tpu.memory_space<vmem>>, %arg8: memref<128x128xf32, #tpu.memory_space<vmem>>) attributes {dimension_semantics = [], scalar_prefetch = 0 : i64, scratch_operands = 0 : i64, tpu.core_type = #tpu.core_type<tc>} {
    %c0 = arith.constant 0 : index
    %c0_0 = arith.constant 0 : index
    %0 = vector.load %arg1[%c0, %c0_0] : memref<128x128xbf16, #tpu.memory_space<vmem>>, vector<128x128xbf16>
    %c0_1 = arith.constant 0 : index
    %c0_2 = arith.constant 0 : index
    %1 = vector.load %arg2[%c0_1, %c0_2] : memref<128x128xbf16, #tpu.memory_space<vmem>>, vector<128x128xbf16>
    %cst = arith.constant dense<0.000000e+00> : vector<128x128xf32>
    %2 = tpu.matmul %0, %1, %cst {dimension_numbers = #tpu.dot_dimension_numbers<[1], [0], [0], [1], [0, 0, 1, 1], [], []>} : vector<128x128xbf16>, vector<128x128xbf16>, vector<128x128xf32> -> vector<128x128xf32>
    %c0_3 = arith.constant 0 : index
    %c0_4 = arith.constant 0 : index
    %3 = vector.load %arg0[%c0_3, %c0_4] : memref<128x128xbf16, #tpu.memory_space<vmem>>, vector<128x128xbf16>
    %4 = arith.truncf %2 : vector<128x128xf32> to vector<128x128xbf16>
    %cst_5 = arith.constant dense<0.000000e+00> : vector<128x128xf32>
    %5 = tpu.matmul %3, %4, %cst_5 {dimension_numbers = #tpu.dot_dimension_numbers<[1], [0], [0], [1], [0, 0, 1, 1], [], []>} : vector<128x128xbf16>, vector<128x128xbf16>, vector<128x128xf32> -> vector<128x128xf32>
    %c0_6 = arith.constant 0 : index
    %c0_7 = arith.constant 0 : index
    %6 = vector.load %arg3[%c0_6, %c0_7] : memref<1x128xf32, #tpu.memory_space<vmem>>, vector<1x128xf32>
    %7 = vector.broadcast %6 : vector<1x128xf32> to vector<128x128xf32>
    %8 = arith.addf %5, %7 : vector<128x128xf32>
    %cst_8 = arith.constant 0.000000e+00 : f32
    %9 = vector.broadcast %cst_8 : f32 to vector<128x128xf32>
    %10 = arith.maximumf %8, %9 : vector<128x128xf32>
    %c0_9 = arith.constant 0 : index
    %c0_10 = arith.constant 0 : index
    %11 = vector.load %arg4[%c0_9, %c0_10] : memref<128x128xbf16, #tpu.memory_space<vmem>>, vector<128x128xbf16>
    %12 = arith.extf %11 : vector<128x128xbf16> to vector<128x128xf32>
    %13 = arith.mulf %10, %12 : vector<128x128xf32>
    %14 = arith.truncf %13 : vector<128x128xf32> to vector<128x128xbf16>
    %c0_11 = arith.constant 0 : index
    %c0_12 = arith.constant 0 : index
    %15 = vector.load %arg5[%c0_11, %c0_12] : memref<128x128xbf16, #tpu.memory_space<vmem>>, vector<128x128xbf16>
    %cst_13 = arith.constant dense<0.000000e+00> : vector<128x128xf32>
    %16 = tpu.matmul %14, %15, %cst_13 {dimension_numbers = #tpu.dot_dimension_numbers<[1], [0], [0], [1], [0, 0, 1, 1], [], []>} : vector<128x128xbf16>, vector<128x128xbf16>, vector<128x128xf32> -> vector<128x128xf32>
    %c0_14 = arith.constant 0 : index
    %c0_15 = arith.constant 0 : index
    %17 = vector.load %arg0[%c0_14, %c0_15] : memref<128x128xbf16, #tpu.memory_space<vmem>>, vector<128x128xbf16>
    %18 = arith.truncf %16 : vector<128x128xf32> to vector<128x128xbf16>
    %cst_16 = arith.constant dense<0.000000e+00> : vector<128x128xf32>
    %19 = tpu.matmul %17, %18, %cst_16 {dimension_numbers = #tpu.dot_dimension_numbers<[1], [0], [0], [1], [0, 0, 1, 1], [], []>} : vector<128x128xbf16>, vector<128x128xbf16>, vector<128x128xf32> -> vector<128x128xf32>
    %c0_17 = arith.constant 0 : index
    %c0_18 = arith.constant 0 : index
    %20 = vector.load %arg6[%c0_17, %c0_18] : memref<1x128xf32, #tpu.memory_space<vmem>>, vector<1x128xf32>
    %21 = vector.broadcast %20 : vector<1x128xf32> to vector<128x128xf32>
    %22 = arith.addf %19, %21 : vector<128x128xf32>
    %c0_19 = arith.constant 0 : index
    %c0_20 = arith.constant 0 : index
    %23 = vector.load %arg7[%c0_19, %c0_20] : memref<128x128xf32, #tpu.memory_space<vmem>>, vector<128x128xf32>
    tpu.vector_store %arg7[%c0_19, %c0_20], %22 {strides = array<i32>} : memref<128x128xf32, #tpu.memory_space<vmem>>, vector<128x128xf32>,
    %24 = tpu.iota {dimensions = array<i32: 1>} : vector<128x128xi32>
    %c8_i32 = arith.constant 8 : i32
    %25 = vector.broadcast %c8_i32 : i32 to vector<128x128xi32>
    %26 = arith.cmpi slt, %24, %25 : vector<128x128xi32>
    %cst_21 = arith.constant 0xFF800000 : f32
    %27 = vector.broadcast %cst_21 : f32 to vector<128x128xf32>
    %28 = arith.select %26, %22, %27 : vector<128x128xi1>, vector<128x128xf32>
    %cst_22 = arith.constant dense<0xFF800000> : vector<128xf32>
    %29 = vector.multi_reduction <maximumf>, %28, %cst_22 [1] : vector<128x128xf32> to vector<128xf32>
    %30 = vector.shape_cast %29 : vector<128xf32> to vector<128x1xf32>
    %31 = vector.broadcast %30 : vector<128x1xf32> to vector<128x128xf32>
    %32 = arith.subf %22, %31 : vector<128x128xf32>
    %33 = math.exp %32 : vector<128x128xf32>
    %cst_23 = arith.constant 0.000000e+00 : f32
    %34 = vector.broadcast %cst_23 : f32 to vector<128x128xf32>
    %35 = arith.select %26, %33, %34 : vector<128x128xi1>, vector<128x128xf32>
    %cst_24 = arith.constant dense<0.000000e+00> : vector<128xf32>
    %36 = vector.multi_reduction <add>, %35, %cst_24 [1] : vector<128x128xf32> to vector<128xf32>
    %37 = vector.shape_cast %36 : vector<128xf32> to vector<128x1xf32>
    %38 = math.log %37 : vector<128x1xf32>
    %39 = arith.addf %38, %30 : vector<128x1xf32>
    %40 = vector.broadcast %39 : vector<128x1xf32> to vector<128x128xf32>
    %41 = arith.subf %22, %40 : vector<128x128xf32>
    %c0_25 = arith.constant 0 : index
    %c0_26 = arith.constant 0 : index
    %42 = vector.load %arg8[%c0_25, %c0_26] : memref<128x128xf32, #tpu.memory_space<vmem>>, vector<128x128xf32>
    tpu.vector_store %arg8[%c0_25, %c0_26], %41 {strides = array<i32>} : memref<128x128xf32, #tpu.memory_space<vmem>>, vector<128x128xf32>,
    return
  }
}

</mosaic_0001>

<bundles_post_ra>
// kernel: mul.9
= control target key start
LH: loop header
LB: loop body
LE: loop exit
PB: predicated region body
PF: predicated region fallthrough
CT: control target
= control target key end

     0   :  { %s34_s0 = inlined_call_operand.vmem [shape: f32[56], index: 0, kind: input, shape index: {}]   ;;  %s35_s1 = inlined_call_operand.vmem [shape: f32[56], index: 1, kind: input, shape index: {}]   ;;  %s36_s2 = inlined_call_operand.vmem [shape: f32[56], index: 2, kind: output, shape index: {}]  }
   0x1   :  { %v3_v0 = vld [vmem:[%s34_s0] sm:$0x1] }
   0x2   :  { %v4_v1 = vld [vmem:[%s35_s1] sm:$0x1] }
   0x3   :  { %v7_v2 = vmul.f32 %v4_v1, %v3_v0 }
   0x5   :  { %9 = vst [vmem:[%s36_s2] sm:$0x1] %v7_v2 }

// kernel: gcn_forward.1
= control target key start
LH: loop header
LB: loop body
LE: loop exit
PB: predicated region body
PF: predicated region fallthrough
CT: control target
= control target key end

     0   :  { %s1949_s2 = inlined_call_operand.vmem [shape: bf16[128,128], index: 2, kind: input, shape index: {}]   ;;  %s1950_s1 = inlined_call_operand.vmem [shape: bf16[128,128], index: 1, kind: input, shape index: {}]   ;;  %s1951_s0 = inlined_call_operand.vmem [shape: bf16[128,128], index: 0, kind: input, shape index: {}]   ;;  %s1952_s5 = inlined_call_operand.vmem [shape: bf16[128,128], index: 5, kind: input, shape index: {}]   ;;  %s1953_s3 = inlined_call_operand.vmem [shape: f32[1,128], index: 3, kind: input, shape index: {}]   ;;  %s1954_s4 = inlined_call_operand.vmem [shape: bf16[128,128], index: 4, kind: input, shape index: {}]   ;;  %s1955_s6 = inlined_call_operand.vmem [shape: f32[1,128], index: 6, kind: input, shape index: {}]   ;;  %s1956_s7 = inlined_call_operand.vmem [shape: f32[128,128], index: 7, kind: output, shape index: {0}]   ;;  %s1957_s8 = inlined_call_operand.vmem [shape: f32[128,128], index: 8, kind: output, shape index: {1}]  }
   0x1   :  { %v1291_v0 = vld [vmem:[%s1949_s2] sm:$0xff]   ;;  %v1292_v1 = vld [vmem:[%s1949_s2 + $0x8] sm:$0xff]   ;;  %v1293_v2 = vld [vmem:[%s1949_s2 + $0x10] sm:$0xff]  }
   0x2   :  { %1163 = vmatprep.subr.bf16.mxu0 %v1291_v0  ;;  %v1294_v3 = vld [vmem:[%s1949_s2 + $0x18] sm:$0xff]   ;;  %v1299_v4 = vld [vmem:[%s1950_s1] sm:$0xff]   ;;  %v1296_v6 = vld [vmem:[%s1949_s2 + $0x28] sm:$0xff]  }
   0x3   :  { %1164 = vmatpush3.bf16.msra.mxu0 %v1291_v0  ;;  %1179 = vmatprep.mubr.bf16.mxu0 %v1299_v4  ;;  %v1295_v5 = vld [vmem:[%s1949_s2 + $0x20] sm:$0xff]   ;;  %v1297_v7 = vld [vmem:[%s1949_s2 + $0x30] sm:$0xff]   ;;  %v1298_v8 = vld [vmem:[%s1949_s2 + $0x38] sm:$0xff]  }
   0x4   :  { %1165 = vmatprep.subr.bf16.mxu0 %v1292_v1  ;;  %v1300_v9 = vld [vmem:[%s1950_s1 + $0x8] sm:$0xff]   ;;  %v1301_v10 = vld [vmem:[%s1950_s1 + $0x10] sm:$0xff]   ;;  %v1302_v11 = vld [vmem:[%s1950_s1 + $0x18] sm:$0xff]  }
   0x5   :  { %v1303_v12 = vld [vmem:[%s1950_s1 + $0x20] sm:$0xff]   ;;  %v1304_v13 = vld [vmem:[%s1950_s1 + $0x28] sm:$0xff]   ;;  %v1305_v14 = vld [vmem:[%s1950_s1 + $0x30] sm:$0xff]  }
   0x6   :  { %v1306_v15 = vld [vmem:[%s1950_s1 + $0x38] sm:$0xff]   ;;  %v1483_v16 = vld [vmem:[%s1951_s0] sm:$0xff]   ;;  %v1316_v18 = vld [vmem:[%s1952_s5 + $0x8] sm:$0xff]  }
   0x7   :  { %1166 = vmatpush3.bf16.msra.mxu0 %v1292_v1  ;;  %1211 = vmatprep.mubr.bf16.mxu1 %v1483_v16  ;;  %v1315_v17 = vld [vmem:[%s1952_s5] sm:$0xff]   ;;  %v1317_v19 = vld [vmem:[%s1952_s5 + $0x10] sm:$0xff]   ;;  %v1318_v20 = vld [vmem:[%s1952_s5 + $0x18] sm:$0xff]  }
   0x8   :  { %1167 = vmatprep.subr.bf16.mxu0 %v1293_v2  ;;  %v1319_v21 = vld [vmem:[%s1952_s5 + $0x20] sm:$0xff]   ;;  %v1504_v46 = vld [vmem:[%s1951_s0 + $0x8] sm:$0xff]   ;;  %v1509_v47 = vld [vmem:[%s1951_s0 + $0x10] sm:$0xff]  }
   0x9   :  { %v1516_v48 = vld [vmem:[%s1951_s0 + $0x18] sm:$0xff]   ;;  %v1521_v49 = vld [vmem:[%s1951_s0 + $0x20] sm:$0xff]   ;;  %v1528_v50 = vld [vmem:[%s1951_s0 + $0x28] sm:$0xff]  }
   0xa   :  { %v1533_v51 = vld [vmem:[%s1951_s0 + $0x30] sm:$0xff]   ;;  %v1540_v52 = vld [vmem:[%s1951_s0 + $0x38] sm:$0xff]   ;;  %v1320_v53 = vld [vmem:[%s1952_s5 + $0x28] sm:$0xff]  }
   0xb   :  { %1168 = vmatpush3.bf16.msra.mxu0 %v1293_v2  ;;  %v1321_v54 = vld [vmem:[%s1952_s5 + $0x30] sm:$0xff]   ;;  %v1322_v55 = vld [vmem:[%s1952_s5 + $0x38] sm:$0xff]   ;;  %v1556_v56 = vld [vmem:[%s1953_s3] ss:$0 sm:$0xff] }
   0xc   :  { %1169 = vmatprep.subr.bf16.mxu0 %v1294_v3  ;;  %v1092_v58 = vld [vmem:[%s1954_s4 + $0x8] sm:$0xff]   ;;  %v1061_v61 = vld [vmem:[%s1954_s4] sm:$0xff]  }
   0xd   :  { %v1066_v1 = vunpack.c.l.bf16 %v1092_v58 }
   0xf   :  { %1170 = vmatpush3.bf16.msra.mxu0 %v1294_v3  ;;  %v1067_v3 = vunpack.c.h.bf16 %v1092_v58 }
  0x10   :  { %1171 = vmatprep.subr.bf16.mxu0 %v1295_v5 }
  0x13   :  { %1172 = vmatpush3.bf16.msra.mxu0 %v1295_v5 }
  0x14   :  { %1173 = vmatprep.subr.bf16.mxu0 %v1296_v6 }
  0x17   :  { %1174 = vmatpush3.bf16.msra.mxu0 %v1296_v6  ;;  %v1062_v6 = vunpack.c.l.bf16 %v1061_v61 }
  0x18   :  { %1175 = vmatprep.subr.bf16.mxu0 %v1297_v7 }
  0x1b   :  { %1176 = vmatpush3.bf16.msra.mxu0 %v1297_v7 }
  0x1c   :  { %1177 = vmatprep.subr.bf16.mxu0 %v1298_v8 }
  0x1f   :  { %1178 = vmatpush3.bf16.msra.mxu0 %v1298_v8  ;;  %v1063_v8 = vunpack.c.h.bf16 %v1061_v61 }
  0x20   :  { %1227 = vmatprep.subr.bf16.mxu0 %v1315_v17 }
  0x22   :  { %1180 = vmatmul.mubr.bf16.vlgmr.msra.gmra.mrb[0].mxu0 %v1300_v9 }
  0x23   :  { %1183 = vmatprep.mubr.bf16.mxu0 %v1301_v10  ;;  %1228 = vmatpush3.bf16.msra.mxu0 %v1315_v17 }
  0x24   :  { %1229 = vmatprep.subr.bf16.mxu0 %v1316_v18 }
  0x27   :  { %1230 = vmatpush3.bf16.msra.mxu0 %v1316_v18 }
  0x28   :  { %1231 = vmatprep.subr.bf16.mxu0 %v1317_v19 }
  0x2a   :  { %1184 = vmatmul.mubr.bf16.gmra.mrb[4].mxu0 %v1302_v11 }
  0x2b   :  { %1187 = vmatprep.mubr.bf16.mxu0 %v1303_v12  ;;  %1232 = vmatpush3.bf16.msra.mxu0 %v1317_v19 }
  0x2c   :  { %1233 = vmatprep.subr.bf16.mxu0 %v1318_v20 }
  0x2f   :  { %1234 = vmatpush3.bf16.msra.mxu0 %v1318_v20  ;;  %v1093_v20 = vld [vmem:[%s1954_s4 + $0x10] sm:$0xff]  }
  0x30   :  { %1235 = vmatprep.subr.bf16.mxu0 %v1319_v21 }
  0x32   :  { %1188 = vmatmul.mubr.bf16.gmra.mrb[8].mxu0 %v1304_v13 }
  0x33   :  { %1191 = vmatprep.mubr.bf16.mxu0 %v1305_v14  ;;  %1236 = vmatpush3.bf16.msra.mxu0 %v1319_v21 }
  0x34   :  { %1237 = vmatprep.subr.bf16.mxu0 %v1320_v53 }
  0x37   :  { %1238 = vmatpush3.bf16.msra.mxu0 %v1320_v53 }
  0x38   :  { %1239 = vmatprep.subr.bf16.mxu0 %v1321_v54 }
  0x3a   :  { %1192 = vmatmul.mubr.bf16.gmra.mrb[12].mxu0 %v1306_v15 }
  0x3b   :  { %1240 = vmatpush3.bf16.msra.mxu0 %v1321_v54 }
  0x3c   :  { %1241 = vmatprep.subr.bf16.mxu0 %v1322_v55 }
  0x3f   :  { %1242 = vmatpush3.bf16.msra.mxu0 %v1322_v55 }
  0xf5   :  { %v1181_v22 = vpop.f32.mrb[0].mxu0 }
  0xf6   :  { %v191_v23 = vpop.f32.mrb[1].mxu0 }
  0xf7   :  { %v1182_v24 = vpop.f32.mrb[2].mxu0 }
  0xf8   :  { %v271_v25 = vpack.c.bf16 %v1182_v24, %v1181_v22  ;;  %v194_v26 = vpop.f32.mrb[3].mxu0 }
  0xf9   :  { %v270_v27 = vpack.c.bf16 %v194_v26, %v191_v23 }
  0xfb   :  { %1195 = vmatprep.subr.bf16.mxu1 %v270_v27 }
  0xfc   :  { %1196 = vmatpush3.bf16.msra.mxu1 %v270_v27 }
  0xfd   :  { %v1185_v28 = vpop.f32.mrb[4].mxu0  ;;  %1197 = vmatprep.subr.bf16.mxu1 %v271_v25 }
  0xfe   :  { %v207_v29 = vpop.f32.mrb[5].mxu0 }
  0xff   :  { %v1186_v30 = vpop.f32.mrb[6].mxu0 }
 0x100   :  { %v273_v31 = vpack.c.bf16 %v1186_v30, %v1185_v28  ;;  %v210_v32 = vpop.f32.mrb[7].mxu0  ;;  %1198 = vmatpush3.bf16.msra.mxu1 %v271_v25  ;;  %v1070_v30 = vunpack.c.l.bf16 %v1093_v20 }
 0x101   :  { %v272_v33 = vpack.c.bf16 %v210_v32, %v207_v29  ;;  %v1071_v32 = vunpack.c.h.bf16 %v1093_v20 }
 0x103   :  { %1199 = vmatprep.subr.bf16.mxu1 %v272_v33 }
 0x104   :  { %1200 = vmatpush3.bf16.msra.mxu1 %v272_v33 }
 0x105   :  { %v1189_v34 = vpop.f32.mrb[8].mxu0  ;;  %1201 = vmatprep.subr.bf16.mxu1 %v273_v31 }
 0x106   :  { %v223_v35 = vpop.f32.mrb[9].mxu0 }
 0x107   :  { %v1190_v36 = vpop.f32.mrb[10].mxu0 }
 0x108   :  { %v275_v37 = vpack.c.bf16 %v1190_v36, %v1189_v34  ;;  %v226_v38 = vpop.f32.mrb[11].mxu0  ;;  %1202 = vmatpush3.bf16.msra.mxu1 %v273_v31 }
 0x109   :  { %v274_v39 = vpack.c.bf16 %v226_v38, %v223_v35 }
 0x10b   :  { %1203 = vmatprep.subr.bf16.mxu1 %v274_v39 }
 0x10c   :  { %1204 = vmatpush3.bf16.msra.mxu1 %v274_v39 }
 0x10d   :  { %v1193_v40 = vpop.f32.mrb[12].mxu0  ;;  %1205 = vmatprep.subr.bf16.mxu1 %v275_v37 }
 0x10e   :  { %v239_v41 = vpop.f32.mrb[13].mxu0 }
 0x10f   :  { %v1194_v42 = vpop.f32.mrb[14].mxu0 }
 0x110   :  { %v277_v43 = vpack.c.bf16 %v1194_v42, %v1193_v40  ;;  %v242_v44 = vpop.f32.mrb[15].mxu0  ;;  %1206 = vmatpush3.bf16.msra.mxu1 %v275_v37  ;;  %v1096_v40 = vld [vmem:[%s1954_s4 + $0x28] sm:$0xff]  }
 0x111   :  { %v276_v45 = vpack.c.bf16 %v242_v44, %v239_v41 }
 0x113   :  { %1207 = vmatprep.subr.bf16.mxu1 %v276_v45 }
 0x114   :  { %1208 = vmatpush3.bf16.msra.mxu1 %v276_v45 }
 0x115   :  { %1209 = vmatprep.subr.bf16.mxu1 %v277_v43 }
 0x118   :  { %1210 = vmatpush3.bf16.msra.mxu1 %v277_v43  ;;  %v1095_v43 = vld [vmem:[%s1954_s4 + $0x20] sm:$0xff]  }
 0x11b   :  { %1212 = vmatmul.mubr.bf16.vlgmr.msra.gmra.mrb[0].mxu1 %v1504_v46 }
 0x11c   :  { %1215 = vmatprep.mubr.bf16.mxu1 %v1509_v47 }
 0x123   :  { %1216 = vmatmul.mubr.bf16.gmra.mrb[4].mxu1 %v1516_v48 }
 0x124   :  { %1219 = vmatprep.mubr.bf16.mxu1 %v1521_v49 }
 0x12b   :  { %1220 = vmatmul.mubr.bf16.gmra.mrb[8].mxu1 %v1528_v50 }
 0x12c   :  { %1223 = vmatprep.mubr.bf16.mxu1 %v1533_v51 }
 0x133   :  { %1224 = vmatmul.mubr.bf16.gmra.mrb[12].mxu1 %v1540_v52 }
 0x134   :  { %1275 = vmatprep.mubr.bf16.mxu1 %v1483_v16  ;;  %v1094_v16 = vld [vmem:[%s1954_s4 + $0x18] sm:$0xff]  }
 0x135   :  { %v1074_v25 = vunpack.c.l.bf16 %v1094_v16  ;;  %v1075_v27 = vunpack.c.h.bf16 %v1094_v16 }
 0x1ee   :  { %v1213_v57 = vpop.f32.mrb[0].mxu1 }
 0x1ef   :  { %v376_v59 = vadd.f32 %v1213_v57, %v1556_v56  ;;  %v367_v60 = vpop.f32.mrb[1].mxu1  ;;  %v1082_v57 = vunpack.c.l.bf16 %v1096_v40 }
 0x1f0   :  { %v368_v62 = vadd.f32 %v1556_v56, %v367_v60  ;;  %v1214_v63 = vpop.f32.mrb[2].mxu1 }
 0x1f1   :  { %v432_v0 = vmax.f32 %v376_v59, 0.0  ;;  %v379_v2 = vadd.f32 %v1214_v63, %v1556_v56  ;;  %v370_v4 = vpop.f32.mrb[3].mxu1  ;;  %v1083_v59 = vunpack.c.h.bf16 %v1096_v40 }
 0x1f2   :  { %v430_v5 = vmax.f32 %v368_v62, 0.0  ;;  %v371_v7 = vadd.f32 %v1556_v56, %v370_v4  ;;  %v1078_v62 = vunpack.c.l.bf16 %v1095_v43 }
 0x1f3   :  { %v433_v9 = vmax.f32 %v379_v2, 0.0  ;;  %v480_v11 = vmul.f32 %v1066_v1, %v432_v0  ;;  %v1079_v0 = vunpack.c.h.bf16 %v1095_v43 }
 0x1f4   :  { %v431_v10 = vmax.f32 %v371_v7, 0.0  ;;  %v478_v13 = vmul.f32 %v1062_v6, %v430_v5 }
 0x1f5   :  { %v481_v12 = vmul.f32 %v1067_v3, %v433_v9 }
 0x1f6   :  { %v479_v14 = vmul.f32 %v1063_v8, %v431_v10  ;;  %v1217_v15 = vpop.f32.mrb[4].mxu1  ;;  %v1098_v8 = vld [vmem:[%s1954_s4 + $0x38] sm:$0xff]  }
 0x1f7   :  { %v495_v17 = vpack.c.bf16 %v481_v12, %v480_v11  ;;  %v392_v18 = vadd.f32 %v1217_v15, %v1556_v56  ;;  %v383_v19 = vpop.f32.mrb[5].mxu1  ;;  %v1097_v11 = vld [vmem:[%s1954_s4 + $0x30] sm:$0xff]  }
 0x1f8   :  { %v384_v21 = vadd.f32 %v1556_v56, %v383_v19  ;;  %v1218_v22 = vpop.f32.mrb[6].mxu1  ;;  %v494_v23 = vpack.c.bf16 %v479_v14, %v478_v13  ;;  %v1091_v19 = vunpack.c.h.bf16 %v1098_v8 }
 0x1f9   :  { %v436_v24 = vmax.f32 %v392_v18, 0.0  ;;  %v395_v26 = vadd.f32 %v1218_v22, %v1556_v56  ;;  %v386_v28 = vpop.f32.mrb[7].mxu1  ;;  %v1086_v22 = vunpack.c.l.bf16 %v1097_v11 }
 0x1fa   :  { %v434_v29 = vmax.f32 %v384_v21, 0.0  ;;  %v387_v31 = vadd.f32 %v1556_v56, %v386_v28  ;;  %1243 = vmatprep.mubr.bf16.mxu0 %v494_v23 }
 0x1fb   :  { %v437_v33 = vmax.f32 %v395_v26, 0.0  ;;  %1244 = vmatmul.mubr.bf16.vlgmr.msra.gmra.mrb[16].mxu0 %v495_v17  ;;  %v484_v35 = vmul.f32 %v1074_v25, %v436_v24  ;;  %v1090_v17 = vunpack.c.l.bf16 %v1098_v8  ;;  %v1087_v24 = vunpack.c.h.bf16 %v1097_v11 }
 0x1fc   :  { %v435_v34 = vmax.f32 %v387_v31, 0.0  ;;  %v482_v37 = vmul.f32 %v1070_v30, %v434_v29 }
 0x1fd   :  { %v485_v36 = vmul.f32 %v1075_v27, %v437_v33 }
 0x1fe   :  { %v483_v38 = vmul.f32 %v1071_v32, %v435_v34  ;;  %v1221_v39 = vpop.f32.mrb[8].mxu1 }
 0x1ff   :  { %v408_v41 = vadd.f32 %v1221_v39, %v1556_v56  ;;  %v399_v42 = vpop.f32.mrb[9].mxu1  ;;  %v497_v44 = vpack.c.bf16 %v485_v36, %v484_v35 }
 0x200   :  { %v400_v45 = vadd.f32 %v1556_v56, %v399_v42  ;;  %v1222_v53 = vpop.f32.mrb[10].mxu1  ;;  %v496_v54 = vpack.c.bf16 %v483_v38, %v482_v37 }
 0x201   :  { %v440_v55 = vmax.f32 %v408_v41, 0.0  ;;  %v411_v58 = vadd.f32 %v1222_v53, %v1556_v56  ;;  %v402_v60 = vpop.f32.mrb[11].mxu1 }
 0x202   :  { %v438_v61 = vmax.f32 %v400_v45, 0.0  ;;  %v403_v63 = vadd.f32 %v1556_v56, %v402_v60  ;;  %1247 = vmatprep.mubr.bf16.mxu0 %v496_v54 }
 0x203   :  { %v441_v1 = vmax.f32 %v411_v58, 0.0  ;;  %1248 = vmatmul.mubr.bf16.gmra.mrb[20].mxu0 %v497_v44  ;;  %v488_v3 = vmul.f32 %v1082_v57, %v440_v55 }
 0x204   :  { %v439_v2 = vmax.f32 %v403_v63, 0.0  ;;  %v486_v5 = vmul.f32 %v1078_v62, %v438_v61 }
 0x205   :  { %v489_v4 = vmul.f32 %v1083_v59, %v441_v1 }
 0x206   :  { %v487_v6 = vmul.f32 %v1079_v0, %v439_v2  ;;  %v1225_v7 = vpop.f32.mrb[12].mxu1  ;;  %v791_v0 = vlaneseq  ;;  %v1610_v2 = vld [vmem:[%s1955_s6] ss:$0 sm:$0xff] }
 0x207   :  { %v424_v9 = vadd.f32 %v1225_v7, %v1556_v56  ;;  %v415_v10 = vpop.f32.mrb[13].mxu1  ;;  %v499_v12 = vpack.c.bf16 %v489_v4, %v488_v3 }
 0x208   :  { %v416_v13 = vadd.f32 %v1556_v56, %v415_v10  ;;  %v1226_v14 = vpop.f32.mrb[14].mxu1  ;;  %v498_v15 = vpack.c.bf16 %v487_v6, %v486_v5  ;;  %v1605_v1 = vand.u32 127, %v791_v0 }
 0x209   :  { %v444_v16 = vmax.f32 %v424_v9, 0.0  ;;  %v427_v18 = vadd.f32 %v1226_v14, %v1556_v56  ;;  %v418_v20 = vpop.f32.mrb[15].mxu1 }
 0x20a   :  { %v442_v21 = vmax.f32 %v416_v13, 0.0  ;;  %v419_v23 = vadd.f32 %v1556_v56, %v418_v20  ;;  %1251 = vmatprep.mubr.bf16.mxu0 %v498_v15  ;;  %vm793_vm0 = vcmp.lt.s32.totalorder %v1605_v1, 8 }
 0x20b   :  { %v445_v25 = vmax.f32 %v427_v18, 0.0  ;;  %1252 = vmatmul.mubr.bf16.gmra.mrb[24].mxu0 %v499_v12  ;;  %v492_v27 = vmul.f32 %v1090_v17, %v444_v16 }
 0x20c   :  { %v443_v26 = vmax.f32 %v419_v23, 0.0  ;;  %v490_v29 = vmul.f32 %v1086_v22, %v442_v21 }
 0x20d   :  { %v493_v28 = vmul.f32 %v1091_v19, %v445_v25 }
 0x20e   :  { %v491_v30 = vmul.f32 %v1087_v24, %v443_v26 }
 0x20f   :  { %v501_v31 = vpack.c.bf16 %v493_v28, %v492_v27 }
 0x210   :  { %v500_v32 = vpack.c.bf16 %v491_v30, %v490_v29 }
 0x212   :  { %1255 = vmatprep.mubr.bf16.mxu0 %v500_v32 }
 0x213   :  { %1256 = vmatmul.mubr.bf16.gmra.mrb[28].mxu0 %v501_v31 }
 0x2ce   :  { %v1245_v33 = vpop.f32.mrb[16].mxu0 }
 0x2cf   :  { %v600_v34 = vpop.f32.mrb[17].mxu0 }
 0x2d0   :  { %v1246_v35 = vpop.f32.mrb[18].mxu0 }
 0x2d1   :  { %v664_v36 = vpack.c.bf16 %v1246_v35, %v1245_v33  ;;  %v603_v37 = vpop.f32.mrb[19].mxu0 }
 0x2d2   :  { %v663_v38 = vpack.c.bf16 %v603_v37, %v600_v34 }
 0x2d4   :  { %1259 = vmatprep.subr.bf16.mxu1 %v663_v38 }
 0x2d5   :  { %1260 = vmatpush3.bf16.msra.mxu1 %v663_v38 }
 0x2d6   :  { %v1249_v56 = vpop.f32.mrb[20].mxu0  ;;  %1261 = vmatprep.subr.bf16.mxu1 %v664_v36 }
 0x2d7   :  { %v616_v39 = vpop.f32.mrb[21].mxu0 }
 0x2d8   :  { %v1250_v40 = vpop.f32.mrb[22].mxu0 }
 0x2d9   :  { %v666_v41 = vpack.c.bf16 %v1250_v40, %v1249_v56  ;;  %v619_v42 = vpop.f32.mrb[23].mxu0  ;;  %1262 = vmatpush3.bf16.msra.mxu1 %v664_v36 }
 0x2da   :  { %v665_v43 = vpack.c.bf16 %v619_v42, %v616_v39 }
 0x2dc   :  { %1263 = vmatprep.subr.bf16.mxu1 %v665_v43 }
 0x2dd   :  { %1264 = vmatpush3.bf16.msra.mxu1 %v665_v43 }
 0x2de   :  { %v1253_v44 = vpop.f32.mrb[24].mxu0  ;;  %1265 = vmatprep.subr.bf16.mxu1 %v666_v41 }
 0x2df   :  { %v632_v45 = vpop.f32.mrb[25].mxu0 }
 0x2e0   :  { %v1254_v53 = vpop.f32.mrb[26].mxu0 }
 0x2e1   :  { %v668_v54 = vpack.c.bf16 %v1254_v53, %v1253_v44  ;;  %v635_v55 = vpop.f32.mrb[27].mxu0  ;;  %1266 = vmatpush3.bf16.msra.mxu1 %v666_v41 }
 0x2e2   :  { %v667_v57 = vpack.c.bf16 %v635_v55, %v632_v45 }
 0x2e4   :  { %1267 = vmatprep.subr.bf16.mxu1 %v667_v57 }
 0x2e5   :  { %1268 = vmatpush3.bf16.msra.mxu1 %v667_v57 }
 0x2e6   :  { %v1257_v58 = vpop.f32.mrb[28].mxu0  ;;  %1269 = vmatprep.subr.bf16.mxu1 %v668_v54 }
 0x2e7   :  { %v648_v59 = vpop.f32.mrb[29].mxu0 }
 0x2e8   :  { %v1258_v60 = vpop.f32.mrb[30].mxu0 }
 0x2e9   :  { %v670_v61 = vpack.c.bf16 %v1258_v60, %v1257_v58  ;;  %v651_v62 = vpop.f32.mrb[31].mxu0  ;;  %1270 = vmatpush3.bf16.msra.mxu1 %v668_v54 }
 0x2ea   :  { %v669_v63 = vpack.c.bf16 %v651_v62, %v648_v59 }
 0x2ec   :  { %1271 = vmatprep.subr.bf16.mxu1 %v669_v63 }
 0x2ed   :  { %1272 = vmatpush3.bf16.msra.mxu1 %v669_v63 }
 0x2ee   :  { %1273 = vmatprep.subr.bf16.mxu1 %v670_v61 }
 0x2f1   :  { %1274 = vmatpush3.bf16.msra.mxu1 %v670_v61 }
 0x2f4   :  { %1276 = vmatmul.mubr.bf16.vlgmr.msra.gmra.mrb[16].mxu1 %v1504_v46 }
 0x2f5   :  { %1279 = vmatprep.mubr.bf16.mxu1 %v1509_v47 }
 0x2fc   :  { %1280 = vmatmul.mubr.bf16.gmra.mrb[20].mxu1 %v1516_v48 }
 0x2fd   :  { %1283 = vmatprep.mubr.bf16.mxu1 %v1521_v49 }
 0x304   :  { %1284 = vmatmul.mubr.bf16.gmra.mrb[24].mxu1 %v1528_v50 }
 0x305   :  { %1287 = vmatprep.mubr.bf16.mxu1 %v1533_v51 }
 0x30c   :  { %1288 = vmatmul.mubr.bf16.gmra.mrb[28].mxu1 %v1540_v52 }
 0x3c7   :  { %v1277_v46 = vpop.f32.mrb[16].mxu1 }
 0x3c8   :  { %v1614_v47 = vadd.f32 %v1277_v46, %v1610_v2  ;;  %v712_v48 = vpop.f32.mrb[17].mxu1 }
 0x3c9   :  { %v1617_v49 = vadd.f32 %v1610_v2, %v712_v48  ;;  %v1278_v50 = vpop.f32.mrb[18].mxu1 }
 0x3ca   :  { %777 = vst [vmem:[%s1956_s7 + $0x10] sm:$0xff] %v1614_v47  ;;  %v1624_v51 = vadd.f32 %v1278_v50, %v1610_v2  ;;  %v715_v52 = vpop.f32.mrb[19].mxu1  ;;  %v796_v3 = vsel %vm793_vm0, %v1614_v47, -inf }
 0x3cb   :  { %775 = vst [vmem:[%s1956_s7] sm:$0xff] %v1617_v49  ;;  %v1634_v4 = vadd.f32 %v1610_v2, %v715_v52  ;;  %814 = vmax.xlane.f32.xlu1 %v796_v3  ;;  %v794_v5 = vsel %vm793_vm0, %v1617_v49, -inf }
 0x3cc   :  { %778 = vst [vmem:[%s1956_s7 + $0x18] sm:$0xff] %v1624_v51  ;;  %810 = vmax.xlane.f32.xlu0 %v794_v5  ;;  %v797_v6 = vsel %vm793_vm0, %v1624_v51, -inf }
 0x3cd   :  { %776 = vst [vmem:[%s1956_s7 + $0x8] sm:$0xff] %v1634_v4  ;;  %v795_v8 = vsel %vm793_vm0, %v1634_v4, -inf }
 0x3cf   :  { %816 = vmax.xlane.f32.xlu1 %v797_v6  ;;  %v1281_v7 = vpop.f32.mrb[20].mxu1 }
 0x3d0   :  { %v1654_v9 = vadd.f32 %v1281_v7, %v1610_v2  ;;  %v728_v10 = vpop.f32.mrb[21].mxu1  ;;  %812 = vmax.xlane.f32.xlu0 %v795_v8 }
 0x3d1   :  { %v1657_v11 = vadd.f32 %v1610_v2, %v728_v10  ;;  %v1282_v12 = vpop.f32.mrb[22].mxu1 }
 0x3d2   :  { %781 = vst [vmem:[%s1956_s7 + $0x30] sm:$0xff] %v1654_v9  ;;  %v1664_v13 = vadd.f32 %v1282_v12, %v1610_v2  ;;  %v731_v14 = vpop.f32.mrb[23].mxu1  ;;  %v800_v15 = vsel %vm793_vm0, %v1654_v9, -inf }
 0x3d3   :  { %779 = vst [vmem:[%s1956_s7 + $0x20] sm:$0xff] %v1657_v11  ;;  %v1674_v16 = vadd.f32 %v1610_v2, %v731_v14  ;;  %v798_v19 = vsel %vm793_vm0, %v1657_v11, -inf }
 0x3d4   :  { %782 = vst [vmem:[%s1956_s7 + $0x38] sm:$0xff] %v1664_v13  ;;  %822 = vmax.xlane.f32.xlu0 %v800_v15  ;;  %v801_v17 = vsel %vm793_vm0, %v1664_v13, -inf }
 0x3d5   :  { %780 = vst [vmem:[%s1956_s7 + $0x28] sm:$0xff] %v1674_v16  ;;  %824 = vmax.xlane.f32.xlu1 %v801_v17  ;;  %v799_v22 = vsel %vm793_vm0, %v1674_v16, -inf }
 0x3d7   :  { %v1285_v18 = vpop.f32.mrb[24].mxu1 }
 0x3d8   :  { %v1691_v20 = vadd.f32 %v1285_v18, %v1610_v2  ;;  %v744_v21 = vpop.f32.mrb[25].mxu1  ;;  %818 = vmax.xlane.f32.xlu0 %v798_v19 }
 0x3d9   :  { %v1697_v23 = vadd.f32 %v1610_v2, %v744_v21  ;;  %v1286_v24 = vpop.f32.mrb[26].mxu1  ;;  %820 = vmax.xlane.f32.xlu1 %v799_v22 }
 0x3da   :  { %785 = vst [vmem:[%s1956_s7 + $0x50] sm:$0xff] %v1691_v20  ;;  %v1704_v25 = vadd.f32 %v1286_v24, %v1610_v2  ;;  %v747_v26 = vpop.f32.mrb[27].mxu1  ;;  %v804_v27 = vsel %vm793_vm0, %v1691_v20, -inf }
 0x3db   :  { %783 = vst [vmem:[%s1956_s7 + $0x40] sm:$0xff] %v1697_v23  ;;  %v1714_v28 = vadd.f32 %v1610_v2, %v747_v26  ;;  %v802_v31 = vsel %vm793_vm0, %v1697_v23, -inf }
 0x3dc   :  { %786 = vst [vmem:[%s1956_s7 + $0x58] sm:$0xff] %v1704_v25  ;;  %830 = vmax.xlane.f32.xlu0 %v804_v27  ;;  %v805_v29 = vsel %vm793_vm0, %v1704_v25, -inf }
 0x3dd   :  { %784 = vst [vmem:[%s1956_s7 + $0x48] sm:$0xff] %v1714_v28  ;;  %832 = vmax.xlane.f32.xlu1 %v805_v29  ;;  %v803_v34 = vsel %vm793_vm0, %v1714_v28, -inf }
 0x3df   :  { %v1289_v30 = vpop.f32.mrb[28].mxu1 }
 0x3e0   :  { %v1731_v32 = vadd.f32 %v1289_v30, %v1610_v2  ;;  %v760_v33 = vpop.f32.mrb[29].mxu1  ;;  %826 = vmax.xlane.f32.xlu0 %v802_v31 }
 0x3e1   :  { %v1737_v35 = vadd.f32 %v1610_v2, %v760_v33  ;;  %v1290_v36 = vpop.f32.mrb[30].mxu1  ;;  %828 = vmax.xlane.f32.xlu1 %v803_v34 }
 0x3e2   :  { %789 = vst [vmem:[%s1956_s7 + $0x70] sm:$0xff] %v1731_v32  ;;  %v1744_v37 = vadd.f32 %v1290_v36, %v1610_v2  ;;  %v763_v38 = vpop.f32.mrb[31].mxu1  ;;  %v808_v41 = vsel %vm793_vm0, %v1731_v32, -inf }
 0x3e3   :  { %787 = vst [vmem:[%s1956_s7 + $0x60] sm:$0xff] %v1737_v35  ;;  %v1751_v56 = vadd.f32 %v1610_v2, %v763_v38  ;;  %v806_v39 = vsel %vm793_vm0, %v1737_v35, -inf }
 0x3e4   :  { %790 = vst [vmem:[%s1956_s7 + $0x78] sm:$0xff] %v1744_v37  ;;  %834 = vmax.xlane.f32.xlu0 %v806_v39  ;;  %v809_v42 = vsel %vm793_vm0, %v1744_v37, -inf }
 0x3e5   :  { %788 = vst [vmem:[%s1956_s7 + $0x68] sm:$0xff] %v1751_v56  ;;  %v807_v40 = vsel %vm793_vm0, %v1751_v56, -inf }
 0x3e6   :  { %836 = vmax.xlane.f32.xlu1 %v807_v40 }
 0x3e8   :  { %838 = vmax.xlane.f32.xlu0 %v808_v41 }
 0x3ea   :  { %840 = vmax.xlane.f32.xlu1 %v809_v42 }
 0x458   :  { %v1773_v43 = vpop.xlane.xlu1 %814 }
 0x459   :  { %v844_v44 = vsub.f32 %v1614_v47, %v1773_v43  ;;  %v1777_v45 = vpop.xlane.xlu0 %810 }
 0x45a   :  { %v842_v53 = vsub.f32 %v1617_v49, %v1777_v45 }
 0x45b   :  { %v862_v54 = vmul.f32 1.442695, %v844_v44 }
 0x45c   :  { %v858_v55 = vmul.f32 1.442695, %v842_v53  ;;  %v1781_v57 = vpop.xlane.xlu1 %816 }
 0x45d   :  { %1323 = vpow2.f32 %v862_v54  ;;  %v845_v58 = vsub.f32 %v1624_v51, %v1781_v57  ;;  %v1785_v59 = vpop.xlane.xlu0 %812 }
 0x45e   :  { %v843_v60 = vsub.f32 %v1634_v4, %v1785_v59  ;;  %1325 = vpow2.f32 %v858_v55 }
 0x45f   :  { %v864_v61 = vmul.f32 1.442695, %v845_v58 }
 0x460   :  { %v860_v62 = vmul.f32 1.442695, %v843_v60 }
 0x461   :  { %1327 = vpow2.f32 %v864_v61  ;;  %v1789_v63 = vpop.xlane.xlu0 %822 }
 0x462   :  { %v848_v0 = vsub.f32 %v1654_v9, %v1789_v63  ;;  %v1793_v2 = vpop.xlane.xlu1 %824  ;;  %1329 = vpow2.f32 %v860_v62 }
 0x463   :  { %v849_v46 = vsub.f32 %v1664_v13, %v1793_v2 }
 0x464   :  { %v870_v48 = vmul.f32 1.442695, %v848_v0 }
 0x465   :  { %v872_v50 = vmul.f32 1.442695, %v849_v46  ;;  %v1797_v52 = vpop.xlane.xlu0 %818 }
 0x466   :  { %1331 = vpow2.f32 %v870_v48  ;;  %v846_v3 = vsub.f32 %v1657_v11, %v1797_v52  ;;  %v1801_v5 = vpop.xlane.xlu1 %820 }
 0x467   :  { %v1324_v6 = vpop.eup %1323  ;;  %1333 = vpow2.f32 %v872_v50  ;;  %v847_v7 = vsub.f32 %v1674_v16, %v1801_v5 }
 0x468   :  { %v866_v8 = vmul.f32 1.442695, %v846_v3  ;;  %v892_v10 = vsel %vm793_vm0, %v1324_v6, 0.0  ;;  %v1326_v12 = vpop.eup %1325 }
 0x469   :  { %v868_v14 = vmul.f32 1.442695, %v847_v7  ;;  %910 = vadd.xlane.f32.xlu0 %v892_v10  ;;  %v1807_v15 = vpop.xlane.xlu0 %830  ;;  %v890_v26 = vsel %vm793_vm0, %v1326_v12, 0.0 }
 0x46a   :  { %1335 = vpow2.f32 %v866_v8  ;;  %v852_v17 = vsub.f32 %v1691_v20, %v1807_v15  ;;  %v1811_v18 = vpop.xlane.xlu1 %832 }
 0x46b   :  { %v1328_v19 = vpop.eup %1327  ;;  %1337 = vpow2.f32 %v868_v14  ;;  %v853_v21 = vsub.f32 %v1704_v25, %v1811_v18 }
 0x46c   :  { %v878_v22 = vmul.f32 1.442695, %v852_v17  ;;  %v893_v24 = vsel %vm793_vm0, %v1328_v19, 0.0  ;;  %v1330_v27 = vpop.eup %1329 }
 0x46d   :  { %v880_v29 = vmul.f32 1.442695, %v853_v21  ;;  %912 = vadd.xlane.f32.xlu1 %v893_v24  ;;  %906 = vadd.xlane.f32.xlu0 %v890_v26  ;;  %v1819_v30 = vpop.xlane.xlu0 %826  ;;  %v891_v39 = vsel %vm793_vm0, %v1330_v27, 0.0 }
 0x46e   :  { %1339 = vpow2.f32 %v878_v22  ;;  %v850_v31 = vsub.f32 %v1697_v23, %v1819_v30  ;;  %v1823_v33 = vpop.xlane.xlu1 %828 }
 0x46f   :  { %1341 = vpow2.f32 %v880_v29  ;;  %v851_v34 = vsub.f32 %v1714_v28, %v1823_v33 }
 0x470   :  { %v1332_v36 = vpop.eup %1331  ;;  %v874_v38 = vmul.f32 1.442695, %v850_v31 }
 0x471   :  { %v1334_v40 = vpop.eup %1333  ;;  %v876_v41 = vmul.f32 1.442695, %v851_v34  ;;  %908 = vadd.xlane.f32.xlu1 %v891_v39  ;;  %v1829_v42 = vpop.xlane.xlu0 %834  ;;  %v896_v44 = vsel %vm793_vm0, %v1332_v36, 0.0 }
 0x472   :  { %1343 = vpow2.f32 %v874_v38  ;;  %v854_v53 = vsub.f32 %v1737_v35, %v1829_v42  ;;  %918 = vadd.xlane.f32.xlu0 %v896_v44  ;;  %v897_v61 = vsel %vm793_vm0, %v1334_v40, 0.0 }
 0x473   :  { %1345 = vpow2.f32 %v876_v41  ;;  %v1835_v54 = vpop.xlane.xlu1 %836 }
 0x474   :  { %v1336_v55 = vpop.eup %1335  ;;  %v882_v58 = vmul.f32 1.442695, %v854_v53  ;;  %v855_v60 = vsub.f32 %v1751_v56, %v1835_v54 }
 0x475   :  { %v1338_v62 = vpop.eup %1337  ;;  %920 = vadd.xlane.f32.xlu1 %v897_v61  ;;  %v1841_v0 = vpop.xlane.xlu0 %838  ;;  %v894_v46 = vsel %vm793_vm0, %v1336_v55, 0.0 }
 0x476   :  { %1347 = vpow2.f32 %v882_v58  ;;  %v884_v48 = vmul.f32 1.442695, %v855_v60  ;;  %v856_v50 = vsub.f32 %v1731_v32, %v1841_v0  ;;  %914 = vadd.xlane.f32.xlu0 %v894_v46  ;;  %v895_v10 = vsel %vm793_vm0, %v1338_v62, 0.0 }
 0x477   :  { %v1847_v3 = vpop.xlane.xlu1 %840 }
 0x478   :  { %v1340_v6 = vpop.eup %1339  ;;  %1349 = vpow2.f32 %v884_v48  ;;  %v886_v7 = vmul.f32 1.442695, %v856_v50  ;;  %v857_v8 = vsub.f32 %v1744_v37, %v1847_v3 }
 0x479   :  { %v1342_v12 = vpop.eup %1341  ;;  %916 = vadd.xlane.f32.xlu1 %v895_v10  ;;  %v900_v14 = vsel %vm793_vm0, %v1340_v6, 0.0 }
 0x47a   :  { %1351 = vpow2.f32 %v886_v7  ;;  %v888_v17 = vmul.f32 1.442695, %v857_v8  ;;  %926 = vadd.xlane.f32.xlu0 %v900_v14  ;;  %v901_v21 = vsel %vm793_vm0, %v1342_v12, 0.0 }
 0x47c   :  { %v1344_v19 = vpop.eup %1343  ;;  %1353 = vpow2.f32 %v888_v17 }
 0x47d   :  { %v1346_v22 = vpop.eup %1345  ;;  %928 = vadd.xlane.f32.xlu1 %v901_v21  ;;  %v898_v24 = vsel %vm793_vm0, %v1344_v19, 0.0 }
 0x47e   :  { %922 = vadd.xlane.f32.xlu0 %v898_v24  ;;  %v899_v27 = vsel %vm793_vm0, %v1346_v22, 0.0 }
 0x480   :  { %v1348_v26 = vpop.eup %1347 }
 0x481   :  { %924 = vadd.xlane.f32.xlu1 %v899_v27  ;;  %v902_v29 = vsel %vm793_vm0, %v1348_v26, 0.0 }
 0x482   :  { %v1350_v31 = vpop.eup %1349  ;;  %930 = vadd.xlane.f32.xlu0 %v902_v29 }
 0x483   :  { %v903_v34 = vsel %vm793_vm0, %v1350_v31, 0.0 }
 0x484   :  { %v1352_v36 = vpop.eup %1351 }
 0x485   :  { %932 = vadd.xlane.f32.xlu1 %v903_v34  ;;  %v904_v38 = vsel %vm793_vm0, %v1352_v36, 0.0 }
 0x486   :  { %v1354_v39 = vpop.eup %1353  ;;  %934 = vadd.xlane.f32.xlu0 %v904_v38 }
 0x487   :  { %v905_v40 = vsel %vm793_vm0, %v1354_v39, 0.0 }
 0x489   :  { %936 = vadd.xlane.f32.xlu1 %v905_v40 }
 0x4f6   :  { %v911_v41 = vpop.xlane.xlu0 %910 }
 0x4f7   :  { %1355 = vlog2.f32 %v911_v41 }
 0x4fa   :  { %v913_v44 = vpop.xlane.xlu1 %912  ;;  %v907_v53 = vpop.xlane.xlu0 %906 }
 0x4fb   :  { %1357 = vlog2.f32 %v913_v44 }
 0x4fc   :  { %1359 = vlog2.f32 %v907_v53 }
 0x4fe   :  { %v909_v55 = vpop.xlane.xlu1 %908 }
 0x4ff   :  { %1361 = vlog2.f32 %v909_v55  ;;  %v919_v58 = vpop.xlane.xlu0 %918 }
 0x500   :  { %1363 = vlog2.f32 %v919_v58 }
 0x501   :  { %v1356_v60 = vpop.eup %1355 }
 0x502   :  { %v943_v61 = vmul.f32 0.6931472, %v1356_v60  ;;  %v921_v62 = vpop.xlane.xlu1 %920 }
 0x503   :  { %1365 = vlog2.f32 %v921_v62  ;;  %v915_v46 = vpop.xlane.xlu0 %914 }
 0x504   :  { %v972_v48 = vadd.f32 %v943_v61, %v1773_v43  ;;  %1367 = vlog2.f32 %v915_v46 }
 0x505   :  { %v1358_v1 = vpop.eup %1357 }
 0x506   :  { %v1360_v50 = vpop.eup %1359  ;;  %v988_v6 = vsub.f32 %v1614_v47, %v972_v48  ;;  %v945_v7 = vmul.f32 0.6931472, %v1358_v1  ;;  %v917_v8 = vpop.xlane.xlu1 %916 }
 0x507   :  { %v939_v10 = vmul.f32 0.6931472, %v1360_v50  ;;  %1369 = vlog2.f32 %v917_v8  ;;  %v927_v12 = vpop.xlane.xlu0 %926 }
 0x508   :  { %1004 = vst [vmem:[%s1957_s8 + $0x10] sm:$0xff] %v988_v6  ;;  %v973_v14 = vadd.f32 %v945_v7, %v1781_v57  ;;  %1371 = vlog2.f32 %v927_v12 }
 0x509   :  { %v1362_v17 = vpop.eup %1361  ;;  %v970_v43 = vadd.f32 %v939_v10, %v1777_v45 }
 0x50a   :  { %v1364_v19 = vpop.eup %1363  ;;  %v989_v21 = vsub.f32 %v1624_v51, %v973_v14  ;;  %v941_v22 = vmul.f32 0.6931472, %v1362_v17  ;;  %v929_v47 = vpop.xlane.xlu1 %928 }
 0x50b   :  { %v986_v24 = vsub.f32 %v1617_v49, %v970_v43  ;;  %v951_v26 = vmul.f32 0.6931472, %v1364_v19  ;;  %1373 = vlog2.f32 %v929_v47  ;;  %v923_v27 = vpop.xlane.xlu0 %922 }
 0x50c   :  { %1005 = vst [vmem:[%s1957_s8 + $0x18] sm:$0xff] %v989_v21  ;;  %v971_v57 = vadd.f32 %v941_v22, %v1785_v59  ;;  %1375 = vlog2.f32 %v923_v27 }
 0x50d   :  { %v1366_v29 = vpop.eup %1365  ;;  %1002 = vst [vmem:[%s1957_s8] sm:$0xff] %v986_v24  ;;  %v976_v51 = vadd.f32 %v951_v26, %v1789_v63 }
 0x50e   :  { %v1368_v45 = vpop.eup %1367  ;;  %v987_v49 = vsub.f32 %v1634_v4, %v971_v57  ;;  %v953_v31 = vmul.f32 0.6931472, %v1366_v29  ;;  %v925_v34 = vpop.xlane.xlu1 %924 }
 0x50f   :  { %v992_v36 = vsub.f32 %v1654_v9, %v976_v51  ;;  %v947_v38 = vmul.f32 0.6931472, %v1368_v45  ;;  %1377 = vlog2.f32 %v925_v34  ;;  %v931_v39 = vpop.xlane.xlu0 %930 }
 0x510   :  { %1003 = vst [vmem:[%s1957_s8 + $0x8] sm:$0xff] %v987_v49  ;;  %v977_v59 = vadd.f32 %v953_v31, %v1793_v2  ;;  %1379 = vlog2.f32 %v931_v39 }
 0x511   :  { %v1370_v40 = vpop.eup %1369  ;;  %1008 = vst [vmem:[%s1957_s8 + $0x30] sm:$0xff] %v992_v36  ;;  %v974_v4 = vadd.f32 %v947_v38, %v1797_v52 }
 0x512   :  { %v1372_v63 = vpop.eup %1371  ;;  %v993_v9 = vsub.f32 %v1664_v13, %v977_v59  ;;  %v949_v41 = vmul.f32 0.6931472, %v1370_v40  ;;  %v933_v44 = vpop.xlane.xlu1 %932 }
 0x513   :  { %v990_v53 = vsub.f32 %v1657_v11, %v974_v4  ;;  %v959_v55 = vmul.f32 0.6931472, %v1372_v63  ;;  %1381 = vlog2.f32 %v933_v44  ;;  %v935_v58 = vpop.xlane.xlu0 %934 }
 0x514   :  { %1009 = vst [vmem:[%s1957_s8 + $0x38] sm:$0xff] %v993_v9  ;;  %v975_v2 = vadd.f32 %v949_v41, %v1801_v5  ;;  %1383 = vlog2.f32 %v935_v58 }
 0x515   :  { %v1374_v60 = vpop.eup %1373  ;;  %1006 = vst [vmem:[%s1957_s8 + $0x20] sm:$0xff] %v990_v53  ;;  %v980_v13 = vadd.f32 %v959_v55, %v1807_v15 }
 0x516   :  { %v1376_v52 = vpop.eup %1375  ;;  %v991_v11 = vsub.f32 %v1674_v16, %v975_v2  ;;  %v961_v61 = vmul.f32 0.6931472, %v1374_v60  ;;  %v937_v62 = vpop.xlane.xlu1 %936 }
 0x517   :  { %v996_v46 = vsub.f32 %v1691_v20, %v980_v13  ;;  %v955_v48 = vmul.f32 0.6931472, %v1376_v52  ;;  %1385 = vlog2.f32 %v937_v62 }
 0x518   :  { %1007 = vst [vmem:[%s1957_s8 + $0x28] sm:$0xff] %v991_v11  ;;  %v981_v5 = vadd.f32 %v961_v61, %v1811_v18 }
 0x519   :  { %v1378_v1 = vpop.eup %1377  ;;  %1012 = vst [vmem:[%s1957_s8 + $0x50] sm:$0xff] %v996_v46  ;;  %v978_v15 = vadd.f32 %v955_v48, %v1819_v30 }
 0x51a   :  { %v1380_v16 = vpop.eup %1379  ;;  %v997_v50 = vsub.f32 %v1704_v25, %v981_v5  ;;  %v957_v6 = vmul.f32 0.6931472, %v1378_v1 }
 0x51b   :  { %v994_v20 = vsub.f32 %v1697_v23, %v978_v15  ;;  %v963_v7 = vmul.f32 0.6931472, %v1380_v16 }
 0x51c   :  { %1013 = vst [vmem:[%s1957_s8 + $0x58] sm:$0xff] %v997_v50  ;;  %v979_v18 = vadd.f32 %v957_v6, %v1823_v33 }
 0x51d   :  { %v1382_v8 = vpop.eup %1381  ;;  %1010 = vst [vmem:[%s1957_s8 + $0x40] sm:$0xff] %v994_v20  ;;  %v982_v30 = vadd.f32 %v963_v7, %v1829_v42 }
 0x51e   :  { %v1384_v10 = vpop.eup %1383  ;;  %v995_v25 = vsub.f32 %v1714_v28, %v979_v18  ;;  %v965_v12 = vmul.f32 0.6931472, %v1382_v8 }
 0x51f   :  { %v998_v23 = vsub.f32 %v1737_v35, %v982_v30  ;;  %v967_v14 = vmul.f32 0.6931472, %v1384_v10 }
 0x520   :  { %1011 = vst [vmem:[%s1957_s8 + $0x48] sm:$0xff] %v995_v25  ;;  %v983_v33 = vadd.f32 %v965_v12, %v1835_v54 }
 0x521   :  { %v1386_v17 = vpop.eup %1385  ;;  %1014 = vst [vmem:[%s1957_s8 + $0x60] sm:$0xff] %v998_v23  ;;  %v984_v42 = vadd.f32 %v967_v14, %v1841_v0 }
 0x522   :  { %v999_v43 = vsub.f32 %v1751_v56, %v983_v33  ;;  %v969_v28 = vmul.f32 0.6931472, %v1386_v17 }
 0x523   :  { %v1000_v19 = vsub.f32 %v1731_v32, %v984_v42 }
 0x524   :  { %1015 = vst [vmem:[%s1957_s8 + $0x68] sm:$0xff] %v999_v43  ;;  %v985_v35 = vadd.f32 %v969_v28, %v1847_v3 }
 0x525   :  { %1016 = vst [vmem:[%s1957_s8 + $0x70] sm:$0xff] %v1000_v19 }
 0x526   :  { %v1001_v54 = vsub.f32 %v1744_v37, %v985_v35 }
 0x528   :  { %1017 = vst [vmem:[%s1957_s8 + $0x78] sm:$0xff] %v1001_v54 }

</bundles_post_ra>
